<compile_context>
chip_gen: v5e
topology: v5e:2x2
jax: 0.10.0
libtpu: 0.0.40
codegen_flags: <defaults>
</compile_context>

<pallas_src>
import functools

import jax
import jax.numpy as jnp
from jax.experimental import pallas as pl
from jax.experimental.pallas import tpu as pltpu


def _round_up(n: int, m: int) -> int:
    return ((n + m - 1) // m) * m


def _pick_tile(dim_p: int, cap: int) -> int:
    """Largest multiple of 128 <= cap that divides dim_p (dim_p itself if <= cap)."""
    if dim_p <= cap:
        return dim_p
    t = (cap // 128) * 128
    while t > 128 and dim_p % t != 0:
        t -= 128
    return t


_T_CHUNK = 256  # one-hot chunk size along the timestep axis


def _gather_emb(t_ref, emb_ref, tm):
    """Fused embedding gather: one-hot(t) @ emb_table on the MXU (exact 0/1 weights)."""
    T_p = emb_ref.shape[0]
    t_vals = t_ref[...]                                                # (tm, 1) i32
    if T_p <= _T_CHUNK:
        iota = jax.lax.broadcasted_iota(jnp.int32, (tm, T_p), 1)
        onehot = (iota == t_vals).astype(jnp.float32)
        return jnp.dot(onehot, emb_ref[...], preferred_element_type=jnp.float32)
    # Large timestep tables: chunk the one-hot matmul to bound vreg pressure.
    tn = emb_ref.shape[1]
    emb = jnp.zeros((tm, tn), jnp.float32)
    for c in range(T_p // _T_CHUNK):
        iota = jax.lax.broadcasted_iota(jnp.int32, (tm, _T_CHUNK), 1) + c * _T_CHUNK
        onehot = (iota == t_vals).astype(jnp.float32)
        emb = emb + jnp.dot(onehot, emb_ref[c * _T_CHUNK:(c + 1) * _T_CHUNK, :],
                            preferred_element_type=jnp.float32)
    return emb


def _cond_linear_kernel(x_ref, w_ref, b_ref, emb_ref, t_ref, o_ref):
    """Grid = (M tiles, N tiles, K tiles); K is the reduction axis.
    The f32 output block is the accumulator (its index map ignores k)."""
    k = pl.program_id(2)

    # MXU: bf16 x bf16 -> f32; the x cast happens here in VMEM, not in the wrapper.
    prod = jnp.dot(x_ref[...].astype(jnp.bfloat16), w_ref[...],
                   preferred_element_type=jnp.float32)

    @pl.when(k == 0)
    def _init():
        o_ref[...] = prod

    @pl.when(k > 0)
    def _accum():
        o_ref[...] += prod

    @pl.when(k == pl.num_programs(2) - 1)
    def _finalize():
        emb = _gather_emb(t_ref, emb_ref, o_ref.shape[0])              # (tm, tn) f32
        o_ref[...] = (o_ref[...] + b_ref[...]) * emb


def prepare_params(w, b, emb_table):
    """One-time pad + cast of the static parameters (hoisted out of the hot path).

    w: (in, hid) f32        -> (in_p, hid_p) bf16
    b: (hid,) f32           -> (1, hid_p) f32
    emb_table: (T, hid) f32 -> (T_p, hid_p) f32
    """
    in_dim, hid = w.shape
    T = emb_table.shape[0]
    in_p = _round_up(in_dim, 128)
    hid_p = _round_up(hid, 128)
    T_p = _round_up(T, _T_CHUNK) if T > _T_CHUNK else _round_up(T, 8)
    w_p = jnp.pad(w, ((0, in_p - in_dim), (0, hid_p - hid))).astype(jnp.bfloat16)
    b_p = jnp.pad(b.reshape(1, hid), ((0, 0), (0, hid_p - hid))).astype(jnp.float32)
    emb_p = jnp.pad(emb_table, ((0, T_p - T), (0, hid_p - hid))).astype(jnp.float32)
    return w_p, b_p, emb_p


@functools.partial(jax.jit, static_argnames=("hidden_size", "tm", "tn", "tk"))
def conditional_linear(x, w_p, b_p, emb_p, t, *, hidden_size, tm=None, tn=None, tk=None):
    """x: (B, in) f32; prepared params from prepare_params(); t: (B,) int -> (B, hid) f32."""
    B, in_dim = x.shape
    in_p, hid_p = w_p.shape
    T_p = emb_p.shape[0]

    # Tile selection: lane-dense N dividing hid_p, K up to the full padded in_dim
    # (single reduction step when it fits), M capped at 128 so batches >= 256
    # keep >= 2 parallel blocks for v7x's two TensorCores.
    if tm is None:
        tm = min(128, _round_up(B, 8))
    if tn is None:
        tn = _pick_tile(hid_p, 512)
    if tk is None:
        tk = _pick_tile(in_p, 2048)
    B_p = _round_up(B, tm)

    # x stays f32 in HBM (bf16 cast happens in-kernel); pad only when needed.
    if (B_p, in_p) != (B, in_dim):
        x = jnp.pad(x, ((0, B_p - B), (0, in_p - in_dim)))
    t_p = t.astype(jnp.int32)
    if B_p != B:
        t_p = jnp.pad(t_p, (0, B_p - B))
    t_p = t_p.reshape(B_p, 1)

    grid = (B_p // tm, hid_p // tn, in_p // tk)

    out = pl.pallas_call(
        _cond_linear_kernel,
        out_shape=jax.ShapeDtypeStruct((B_p, hid_p), jnp.float32),
        grid_spec=pltpu.PrefetchScalarGridSpec(
            num_scalar_prefetch=0,
            grid=grid,
            in_specs=[
                pl.BlockSpec((tm, tk), lambda i, j, k: (i, k)),    # x tile (f32)
                pl.BlockSpec((tk, tn), lambda i, j, k: (k, j)),    # W tile (bf16)
                pl.BlockSpec((1, tn), lambda i, j, k: (0, j)),     # bias column tile
                pl.BlockSpec((T_p, tn), lambda i, j, k: (0, j)),   # emb column tile
                pl.BlockSpec((tm, 1), lambda i, j, k: (i, 0)),     # t per batch tile
            ],
            out_specs=pl.BlockSpec((tm, tn), lambda i, j, k: (i, j)),
        ),
        compiler_params=pltpu.CompilerParams(
            dimension_semantics=("parallel", "parallel", "arbitrary"),
            vmem_limit_bytes=48 * 1024 * 1024,
        ),
    )(x, w_p, b_p, emb_p, t_p)

    if (B_p, hid_p) != (B, hidden_size):
        out = out[:B, :hidden_size]
    return out


def init_params(key, input_size, hidden_size, timesteps):
    """Deterministic init matching the PyTorch module's __init__ distributions."""
    k_w, k_b, k_e = jax.random.split(key, 3)
    bound = 1.0 / float(input_size) ** 0.5
    # nn.Linear: weight (hid, in) ~ U(-bound, bound); stored transposed (in, hid).
    w = jax.random.uniform(k_w, (input_size, hidden_size), jnp.float32,
                           minval=-bound, maxval=bound)
    b = jax.random.uniform(k_b, (hidden_size,), jnp.float32,
                           minval=-bound, maxval=bound)
    # nn.Embedding weight .uniform_() -> U(0, 1)
    emb_table = jax.random.uniform(k_e, (timesteps, hidden_size), jnp.float32,
                                   minval=0.0, maxval=1.0)
    return w, b, emb_table


def _reference(x, w, b, emb_table, t):
    # Reference with the same bf16 rounding of x / W that the kernel applies.
    xr = x.astype(jnp.bfloat16).astype(jnp.float32)
    wr = w.astype(jnp.bfloat16).astype(jnp.float32)
    return (xr @ wr + b) * jnp.take(emb_table, t, axis=0)


def _run_case(key, B, input_size, hidden_size, timesteps, **tiles):
    k_x, k_t, k_p = jax.random.split(key, 3)
    x = jax.random.normal(k_x, (B, input_size), jnp.float32)
    t = jax.random.randint(k_t, (B,), 0, timesteps, jnp.int32)
    w, b, emb_table = init_params(k_p, input_size, hidden_size, timesteps)
    w_p, b_p, emb_p = prepare_params(w, b, emb_table)

    out = conditional_linear(x, w_p, b_p, emb_p, t, hidden_size=hidden_size, **tiles)
    out = jax.block_until_ready(out)

    ref = _reference(x, w, b, emb_table, t)
    assert out.shape == (B, hidden_size)
    assert jnp.allclose(out, ref, atol=5e-3, rtol=5e-3), (
        f"mismatch: max abs err {jnp.max(jnp.abs(out - ref))}")


if __name__ == "__main__":
    key = jax.random.PRNGKey(0)
    k1, k2, k3 = jax.random.split(key, 3)

    # Case 1: aligned shapes -> no wrapper pad/cast/slice, grid (2, 1, 1)
    #         (two parallel M blocks for v7x's second TensorCore).
    _run_case(k1, B=256, input_size=384, hidden_size=256, timesteps=40)

    # Case 2: small, non-128-aligned shapes (original toy size) -> padding path.
    _run_case(k2, B=8, input_size=32, hidden_size=32, timesteps=16)

    # Case 3: forced small K tile to exercise the K-axis accumulation path.
    _run_case(k3, B=64, input_size=256, hidden_size=256, timesteps=16, tk=128)

    print("KERNEL_OK")
</pallas_src>

<mosaic_0001>
module attributes {stable_mosaic.version = 11 : i64} {
  func.func @_cond_linear_kernel(%arg0: i32, %arg1: i32, %arg2: i32, %arg3: memref<128x384xf32, #tpu.memory_space<vmem>>, %arg4: memref<384x256xbf16, #tpu.memory_space<vmem>>, %arg5: memref<1x256xf32, #tpu.memory_space<vmem>>, %arg6: memref<40x256xf32, #tpu.memory_space<vmem>>, %arg7: memref<128x1xi32, #tpu.memory_space<vmem>>, %arg8: memref<128x256xf32, #tpu.memory_space<vmem>>) attributes {dimension_semantics = [#tpu.dimension_semantics<parallel>, #tpu.dimension_semantics<parallel>, #tpu.dimension_semantics<arbitrary>], iteration_bounds = array<i64: 2, 1, 1>, scalar_prefetch = 0 : i64, scratch_operands = 0 : i64, tpu.core_type = #tpu.core_type<tc>, window_params = [{transform_indices = @transform_0, window_bounds = array<i64: 128, 384>}, {transform_indices = @transform_1, window_bounds = array<i64: 384, 256>}, {transform_indices = @transform_2, window_bounds = array<i64: 1, 256>}, {transform_indices = @transform_3, window_bounds = array<i64: 40, 256>}, {transform_indices = @transform_4, window_bounds = array<i64: 128, 1>}, {transform_indices = @transform_5, window_bounds = array<i64: 128, 256>}]} {
    %c0 = arith.constant 0 : index
    %c0_0 = arith.constant 0 : index
    %0 = vector.load %arg3[%c0, %c0_0] : memref<128x384xf32, #tpu.memory_space<vmem>>, vector<128x384xf32>
    %1 = arith.truncf %0 : vector<128x384xf32> to vector<128x384xbf16>
    %c0_1 = arith.constant 0 : index
    %c0_2 = arith.constant 0 : index
    %2 = vector.load %arg4[%c0_1, %c0_2] : memref<384x256xbf16, #tpu.memory_space<vmem>>, vector<384x256xbf16>
    %cst = arith.constant dense<0.000000e+00> : vector<128x256xf32>
    %3 = tpu.matmul %1, %2, %cst {dimension_numbers = #tpu.dot_dimension_numbers<[1], [0], [0], [1], [0, 0, 1, 1], [], []>} : vector<128x384xbf16>, vector<384x256xbf16>, vector<128x256xf32> -> vector<128x256xf32>
    %c0_i32 = arith.constant 0 : i32
    %4 = arith.cmpi eq, %arg2, %c0_i32 : i32
    %5 = arith.extui %4 : i1 to i32
    %c0_i32_3 = arith.constant 0 : i32
    %6 = arith.cmpi ne, %5, %c0_i32_3 : i32
    scf.if %6 {
      %c0_8 = arith.constant 0 : index
      %c0_9 = arith.constant 0 : index
      %13 = vector.load %arg8[%c0_8, %c0_9] : memref<128x256xf32, #tpu.memory_space<vmem>>, vector<128x256xf32>
      tpu.vector_store %arg8[%c0_8, %c0_9], %3 {strides = array<i32>} : memref<128x256xf32, #tpu.memory_space<vmem>>, vector<128x256xf32>,
    } else {
    }
    %c0_i32_4 = arith.constant 0 : i32
    %7 = arith.cmpi sgt, %arg2, %c0_i32_4 : i32
    %8 = arith.extui %7 : i1 to i32
    %c0_i32_5 = arith.constant 0 : i32
    %9 = arith.cmpi ne, %8, %c0_i32_5 : i32
    scf.if %9 {
      %c0_8 = arith.constant 0 : index
      %c0_9 = arith.constant 0 : index
      %13 = vector.load %arg8[%c0_8, %c0_9] : memref<128x256xf32, #tpu.memory_space<vmem>>, vector<128x256xf32>
      %14 = arith.addf %13, %3 : vector<128x256xf32>
      %c0_10 = arith.constant 0 : index
      %c0_11 = arith.constant 0 : index
      %15 = vector.load %arg8[%c0_10, %c0_11] : memref<128x256xf32, #tpu.memory_space<vmem>>, vector<128x256xf32>
      tpu.vector_store %arg8[%c0_10, %c0_11], %14 {strides = array<i32>} : memref<128x256xf32, #tpu.memory_space<vmem>>, vector<128x256xf32>,
    } else {
    }
    %c0_i32_6 = arith.constant 0 : i32
    %10 = arith.cmpi eq, %arg2, %c0_i32_6 : i32
    %11 = arith.extui %10 : i1 to i32
    %c0_i32_7 = arith.constant 0 : i32
    %12 = arith.cmpi ne, %11, %c0_i32_7 : i32
    scf.if %12 {
      %c0_8 = arith.constant 0 : index
      %c0_9 = arith.constant 0 : index
      %13 = vector.load %arg7[%c0_8, %c0_9] : memref<128x1xi32, #tpu.memory_space<vmem>>, vector<128x1xi32>
      %14 = tpu.iota {dimensions = array<i32: 1>} : vector<128x40xi32>
      %15 = vector.broadcast %13 : vector<128x1xi32> to vector<128x40xi32>
      %16 = arith.cmpi eq, %14, %15 : vector<128x40xi32>
      %17 = arith.extui %16 : vector<128x40xi1> to vector<128x40xi32>
      %18 = arith.sitofp %17 : vector<128x40xi32> to vector<128x40xf32>
      %c0_10 = arith.constant 0 : index
      %c0_11 = arith.constant 0 : index
      %19 = vector.load %arg6[%c0_10, %c0_11] : memref<40x256xf32, #tpu.memory_space<vmem>>, vector<40x256xf32>
      %cst_12 = arith.constant dense<0.000000e+00> : vector<128x256xf32>
      %20 = tpu.matmul %18, %19, %cst_12 {dimension_numbers = #tpu.dot_dimension_numbers<[1], [0], [0], [1], [0, 0, 1, 1], [], []>} : vector<128x40xf32>, vector<40x256xf32>, vector<128x256xf32> -> vector<128x256xf32>
      %c0_13 = arith.constant 0 : index
      %c0_14 = arith.constant 0 : index
      %21 = vector.load %arg8[%c0_13, %c0_14] : memref<128x256xf32, #tpu.memory_space<vmem>>, vector<128x256xf32>
      %c0_15 = arith.constant 0 : index
      %c0_16 = arith.constant 0 : index
      %22 = vector.load %arg5[%c0_15, %c0_16] : memref<1x256xf32, #tpu.memory_space<vmem>>, vector<1x256xf32>
      %23 = vector.broadcast %22 : vector<1x256xf32> to vector<128x256xf32>
      %24 = arith.addf %21, %23 : vector<128x256xf32>
      %25 = arith.mulf %24, %20 : vector<128x256xf32>
      %c0_17 = arith.constant 0 : index
      %c0_18 = arith.constant 0 : index
      %26 = vector.load %arg8[%c0_17, %c0_18] : memref<128x256xf32, #tpu.memory_space<vmem>>, vector<128x256xf32>
      tpu.vector_store %arg8[%c0_17, %c0_18], %25 {strides = array<i32>} : memref<128x256xf32, #tpu.memory_space<vmem>>, vector<128x256xf32>,
    } else {
    }
    return
  }
  func.func @transform_0(%arg0: i32, %arg1: i32, %arg2: i32) -> (i32, i32) {
    %c0_i32 = arith.constant 0 : i32
    return %arg0, %arg2 : i32, i32
  }
  func.func @transform_1(%arg0: i32, %arg1: i32, %arg2: i32) -> (i32, i32) {
    %c0_i32 = arith.constant 0 : i32
    return %arg2, %arg1 : i32, i32
  }
  func.func @transform_2(%arg0: i32, %arg1: i32, %arg2: i32) -> (i32, i32) {
    %c0_i32 = arith.constant 0 : i32
    %c0_i32_0 = arith.constant 0 : i32
    return %c0_i32, %arg1 : i32, i32
  }
  func.func @transform_3(%arg0: i32, %arg1: i32, %arg2: i32) -> (i32, i32) {
    %c0_i32 = arith.constant 0 : i32
    %c0_i32_0 = arith.constant 0 : i32
    return %c0_i32, %arg1 : i32, i32
  }
  func.func @transform_4(%arg0: i32, %arg1: i32, %arg2: i32) -> (i32, i32) {
    %c0_i32 = arith.constant 0 : i32
    %c0_i32_0 = arith.constant 0 : i32
    return %arg0, %c0_i32 : i32, i32
  }
  func.func @transform_5(%arg0: i32, %arg1: i32, %arg2: i32) -> (i32, i32) {
    %c0_i32 = arith.constant 0 : i32
    return %arg0, %arg1 : i32, i32
  }
}

</mosaic_0001>

<bundles_post_ra>
// kernel: conditional_linear.1
= control target key start
LH: loop header
LB: loop body
LE: loop exit
PB: predicated region body
PF: predicated region fallthrough
CT: control target
= control target key end

     0   :  { %s2943_s0 = inlined_call_operand.hbm [shape: f32[256,384], index: 0, kind: input, shape index: {}]   ;;  %s2944_s1 = inlined_call_operand.hbm [shape: bf16[384,256], index: 1, kind: input, shape index: {}]   ;;  %s2945_s2 = inlined_call_operand.vmem [shape: f32[1,256], index: 2, kind: input, shape index: {}]   ;;  %s2946_s3 = inlined_call_operand.vmem [shape: f32[40,256], index: 3, kind: input, shape index: {}]   ;;  %s2947_s4 = inlined_call_operand.vmem [shape: s32[256,1], index: 4, kind: input, shape index: {}]   ;;  %s2948_s5 = inlined_call_operand.hbm [shape: f32[256,256], index: 5, kind: output, shape index: {}]  }
   0x1   :  { %2950 = sst [smem:[#allocation12_spill]] %s2944_s1 }
   0x2   :  { %10 = vsyncpa [#allocation3], 0 }
   0x3   :  { %12 = vsyncpa [#allocation3 + $0x1], 0 }
   0x4   :  { %13 = vsyncpa [#allocation6], 0 }
   0x5   :  { %14 = vsyncpa [#allocation4], 0 }
   0x6   :  { %16 = vsyncpa [#allocation4 + $0x1], 0  ;;  %s2348_s18 = smov 0   ;;  %s2350_s19 = smov 0  }
   0x7   :  { %s2352_s20 = smov 0   ;;  %s2354_s21 = smov 0  }
   0x8   :  { %s2356_s22 = smov 0   ;;  %s2358_s23 = smov 0  }
   0x9 LB: > { %s1763_s24 = sadd.s32 4294967295, %s2307_s23   ;;  %s1764_s25 = sadd.s32 4294967294, %s2307_s23   ;;  %s2307_s23 = sphi %s2358_s23, %s22_s23   ;;  %s2303_s22 = sphi %s2356_s22, %s2964_s22   ;;  %s2299_s21 = sphi %s2354_s21, %s2963_s21   ;;  %s2295_s20 = sphi %s2352_s20, %s2962_s20   ;;  %s2291_s19 = sphi %s2350_s19, %s2961_s19   ;;  %s2287_s18 = sphi %s2348_s18, %s2960_s18  }
   0xa   : > { %p63_p0 = scmp.ne.s32.totalorder %s2291_s19, %s2287_s18  ;;  %p2382_p1 = scmp.eq.s32.totalorder %s1763_s24, 0 }
   0xb   : > { %p2386_p2 = scmp.eq.s32.totalorder %s1763_s24, 1  ;;  %p201_p3 = scmp.eq.s32.totalorder %s1764_s25, 1 }
   0xc   : > { %p2392_p4 = por %p2382_p1, %p63_p0  ;;  %p1765_p5 = scmp.ge.s32.totalorder %s2307_s23, 1 }
   0xd   : > { %p2397_p6 = por %p201_p3, %p63_p0  ;;  %p208_p7 = scmp.lt.s32.totalorder %s2307_s23, 3 }
   0xe   : > { %s2955_s1 = sld [smem:[#allocation12_spill]]  ;;  %s2309_s9 = smov [#allocation5]  }
   0xf   : > { %p2405_p8 = pnand %p1765_p5, %p208_p7  ;;  %s227_s10 = sshll.u32 %s2309_s9, 4  ;;  %s228_s10 = int_to_ptr.vmem [resolvable:$true] %s227_s10 }
  0x10   : > { %p1769_p11 = scmp.ge.s32.totalorder %s2307_s23, 2  ;;  %s2310_s11 = smov 128  }
  0x11   : > { %p2085_p9 = pneg %p2405_p8  ;;  %s2311_s12 = smov 8  }
  0x12   : > { %s41_s13 = sadd.s32 1, %s2303_s22  ;;  %s50_s14 = sadd.s32 1, %s2295_s20 }
  0x13   : > { %p2086_p10 = pnand %p2085_p9, %p2382_p1  ;;  %p43_p12 = scmp.ge.s32.totalorder %s41_s13, 2 }
  0x14   : > { %s225_s7 = sshll.u32 %s2955_s1, 4  ;;  %p57_p13 = scmp.ne.s32.totalorder %s2295_s20, %s2291_s19  ;;  %s226_s7 = int_to_ptr.hbm [resolvable:$true] %s225_s7 }
  0x15   : > { %2088 = dma.hbm_to_vmem [thread:$0]  (!%p2086_p10), %s226_s7, 6144, %s228_s10, [#allocation6], %s2310_s11, %s2310_s11, %s2311_s12  }
  0x16   : > { %p58_p0 = scmp.eq.s32.totalorder %s2307_s23, 0  ;;  %s2966_s13 = smov (%p43_p12, %s41_s13), 0 }
  0x17   : > { %2957 = sst [smem:[#allocation11_spill]] %s2966_s13  ;;  %p2423_p5 = por %p2386_p2, %p57_p13 }
  0x18   : > { %p59_p3 = por %p58_p0, %p57_p13  ;;  %s45_s16 = ssub.s32 %s2303_s22, %s2966_s13 }
  0x19   : > { %p2098_p7 = scmp.lt.s32.totalorder %s2307_s23, 2  ;;  %p48_p9 = scmp.eq.s32.totalorder %s45_s16, 0 }
  0x1a   : > { %s258_s17 = sand.u32 1, %s2295_s20   ;;  %s2075_s30 = smul.u32 384, %s2303_s22 }
  0x1b   : > { %s2074_s24 = smul.u32 384, %s258_s17  ;;  %p2090_p10 = pnand %p2098_p7, %p59_p3 }
  0x1c   : > { %s2432_s25 = scalar_select %p48_p9, %s2295_s20, %s50_s14  }
  0x1d   : > { %s262_s6 = scalar_lea.vmem [#allocation2], %s2074_s24  ;;  %s270_s11 = scalar_lea.hbm %s2943_s0, %s2075_s30 }
  0x1e   : > { %s273_s7 = sshll.u32 %s262_s6, 4  ;;  %s271_s27 = sshll.u32 %s270_s11, 4  ;;  %s274_s7 = int_to_ptr.vmem [resolvable:$true] %s273_s7  ;;  %s272_s27 = int_to_ptr.hbm [resolvable:$true] %s271_s27 }
  0x1f   : > { %s259_s12 = scalar_lea.sflag [#allocation3], %s258_s17  ;;  %s2312_s1 = smov 384  }
  0x20   : > { %s2313_s13 = smov 24   ;;  %294 = sbr.rel (%p2405_p8) target bundleno = 465 (0x1d1), region = 40 }
  0x21   : > { %2092 = dma.hbm_to_vmem [thread:$0]  (!%p2090_p10), %s272_s27, 6144, %s274_s7, %s259_s12, %s2312_s1, %s2312_s1, %s2313_s13  }
  0x22   : > { %s2441_s14 = sand.u32 (!%p2405_p8), 1, %s2291_s19  }
  0x23   : > { %s2076_s16 = smul.u32 (!%p2405_p8), 384, %s2441_s14  ;;  %s297_s24 = scalar_lea.sflag (!%p2405_p8), [#allocation3], %s2441_s14 }
  0x25   : > { %s2445_s6 = scalar_lea.vmem [#allocation2], %s2076_s16 }
  0x26   : > { %2274 = dma.done.wait (%p2392_p4), %s297_s24, 6144  }
  0x27   : > { %2276 = vsyncadd (%p2392_p4), %s297_s24, 4294961152 }
  0x28   : > { %2278 = dma.done.wait (%p2382_p1), [#allocation6], 6144  }
  0x29   : > { %2280 = vsyncadd (%p2382_p1), [#allocation6], 4294961152  ;;  %s1776_s1 = sshll.u32 %s2299_s21, 4  ;;  %v2314_v0 = vmov 0   ;;  %v1836_v1 = vld [vmem:[#allocation5 + $0x70] sm:$0xf] }
  0x2a   : > { %2158 = vset.pattern.permute.xlu0 %v2314_v0  ;;  %p363_p2 = scmp.lt.s32.totalorder %s1776_s1, 31  ;;  %2159 = vset.pattern.permute.xlu1 %v2314_v0  ;;  %v2039_v2 = vld [vmem:[#allocation5 + $0x74] sm:$0xf0]  ;;  %v1900_v3 = vld [vmem:[#allocation5 + $0xf0] sm:$0xf]  ;;  %vm1287_vm4 = vcmask 326656  }
  0x2b   : > { %2160 = vset.pattern.permute.xlu2 %v2314_v0  ;;  %v1837_v4 = vor.u32 %v2039_v2, %v1836_v1  ;;  %v2055_v5 = vld [vmem:[#allocation5 + $0xf4] sm:$0xf0]  ;;  %v1964_v6 = vld [vmem:[#allocation5 + $0x170] sm:$0xf]  ;;  %v2038_v10 = vld [vmem:[#allocation5 + $0x74] sm:$0xf] }
  0x2c   : > { %s2968_s1 = smov (!%p363_p2, %s1776_s1), 31  ;;  %v2071_v7 = vld [vmem:[#allocation5 + $0x174] sm:$0xf0]  ;;  %v1901_v8 = vor.u32 %v2055_v5, %v1900_v3  ;;  %v1838_v11 = vld [vmem:[#allocation5 + $0x78] sm:$0xf0]  ;;  %s1775_s27 = sshll.u32 %s2441_s14, 8 }
  0x2d   : > { %s1777_s8 = sshll.u32 %s2968_s1, 3  ;;  %v1965_v9 = vor.u32 %v2071_v7, %v1964_v6  ;;  %v1828_v12 = vld [vmem:[#allocation5 + $0x60] sm:$0xf]  ;;  %730 = vmatpush.bf16.msra.mxu0 %v1837_v4  ;;  %v1841_v13 = vor.u32 %v2038_v10, %v1838_v11  ;;  %v2037_v14 = vld [vmem:[#allocation5 + $0x64] sm:$0xf0]  ;;  %s2811_s12 = scalar_lea.vmem [#allocation7], %s1775_s27 }
  0x2e   : > { %v1892_v15 = vld [vmem:[#allocation5 + $0xe0] sm:$0xf]  ;;  %v2053_v16 = vld [vmem:[#allocation5 + $0xe4] sm:$0xf0]  ;;  %779 = vmatpush.bf16.msra.mxu1 %v1901_v8  ;;  %v1829_v17 = vor.u32 %v2037_v14, %v1828_v12  ;;  %v2036_v21 = vld [vmem:[#allocation5 + $0x64] sm:$0xf]  ;;  %s2464_s13 = scalar_lea.vmem %s2947_s4, %s1777_s8 }
  0x2f   : > { %828 = vmatpush.bf16.msra.mxu2 %v1965_v9  ;;  %v1893_v18 = vor.u32 %v2053_v16, %v1892_v15  ;;  %v1956_v19 = vld [vmem:[#allocation5 + $0x160] sm:$0xf]  ;;  %v2069_v20 = vld [vmem:[#allocation5 + $0x164] sm:$0xf0]  ;;  %877 = vmatpush.bf16.msra.mxu3 %v1841_v13  ;;  %v1830_v23 = vld [vmem:[#allocation5 + $0x68] sm:$0xf0] }
  0x30   : > { %v1957_v22 = vor.u32 %v2069_v20, %v1956_v19  ;;  %v1820_v24 = vld [vmem:[#allocation5 + $0x50] sm:$0xf]  ;;  %v2035_v25 = vld [vmem:[#allocation5 + $0x54] sm:$0xf0]  ;;  %v1833_v26 = vor.u32 %v2036_v21, %v1830_v23  ;;  %v2034_v32 = vld [vmem:[#allocation5 + $0x54] sm:$0xf] }
  0x31   : > { %v1884_v27 = vld [vmem:[#allocation5 + $0xd0] sm:$0xf]  ;;  %v2051_v28 = vld [vmem:[#allocation5 + $0xd4] sm:$0xf0]  ;;  %731 = vmatpush.bf16.msra.mxu0 %v1829_v17  ;;  %v1821_v30 = vor.u32 %v2035_v25, %v1820_v24  ;;  %v1822_v33 = vld [vmem:[#allocation5 + $0x58] sm:$0xf0] }
  0x32   : > { %v1948_v29 = vld [vmem:[#allocation5 + $0x150] sm:$0xf]  ;;  %v2067_v31 = vld [vmem:[#allocation5 + $0x154] sm:$0xf0]  ;;  %780 = vmatpush.bf16.msra.mxu1 %v1893_v18  ;;  %v1885_v34 = vor.u32 %v2051_v28, %v1884_v27  ;;  %v1163_v36 = vld [vmem:[%s2464_s13] sm:$0xff]  ;;  %v1825_v39 = vor.u32 %v2034_v32, %v1822_v33  ;;  %s2073_s16 = sshll.u32 %s2299_s21, 8 }
  0x33   : > { %829 = vmatpush.bf16.msra.mxu2 %v1957_v22  ;;  %v1949_v35 = vor.u32 %v2067_v31, %v1948_v29  ;;  %v1812_v37 = vld [vmem:[#allocation5 + $0x40] sm:$0xf]  ;;  %v2033_v38 = vld [vmem:[#allocation5 + $0x44] sm:$0xf0]  ;;  %878 = vmatpush.bf16.msra.mxu3 %v1833_v26  ;;  %v2032_v44 = vld [vmem:[#allocation5 + $0x44] sm:$0xf]  ;;  %s1615_s8 = scalar_lea.hbm %s2948_s5, %s2073_s16 }
  0x34   : > { %1182 = vperm.xlu0 %2158, %v1163_v36   ;;  %v1876_v40 = vld [vmem:[#allocation5 + $0xc0] sm:$0xf]  ;;  %v2049_v41 = vld [vmem:[#allocation5 + $0xc4] sm:$0xf0]  ;;  %v1814_v45 = vld [vmem:[#allocation5 + $0x48] sm:$0xf0]  ;;  %v1813_v46 = vor.u32 %v2033_v38, %v1812_v37 }
  0x35   : > { %v1940_v42 = vld [vmem:[#allocation5 + $0x140] sm:$0xf]  ;;  %v2065_v43 = vld [vmem:[#allocation5 + $0x144] sm:$0xf0]  ;;  %732 = vmatpush.bf16.msra.mxu0 %v1821_v30  ;;  %v1877_v47 = vor.u32 %v2049_v41, %v1876_v40  ;;  %v1804_v49 = vld [vmem:[#allocation5 + $0x30] sm:$0xf]  ;;  %v1817_v52 = vor.u32 %v2032_v44, %v1814_v45 }
  0x36   : > { %781 = vmatpush.bf16.msra.mxu1 %v1885_v34  ;;  %v1941_v48 = vor.u32 %v2065_v43, %v1940_v42  ;;  %v2031_v50 = vld [vmem:[#allocation5 + $0x34] sm:$0xf0]  ;;  %v1868_v51 = vld [vmem:[#allocation5 + $0xb0] sm:$0xf]  ;;  %v2030_v56 = vld [vmem:[#allocation5 + $0x34] sm:$0xf] }
  0x37   : > { %830 = vmatpush.bf16.msra.mxu2 %v1949_v35  ;;  %879 = vmatpush.bf16.msra.mxu3 %v1825_v39  ;;  %v2047_v53 = vld [vmem:[#allocation5 + $0xb4] sm:$0xf0]  ;;  %v1932_v54 = vld [vmem:[#allocation5 + $0x130] sm:$0xf]  ;;  %v1806_v57 = vld [vmem:[#allocation5 + $0x38] sm:$0xf0]  ;;  %v1805_v59 = vor.u32 %v2031_v50, %v1804_v49 }
  0x38   : > { %v2063_v55 = vld [vmem:[#allocation5 + $0x134] sm:$0xf0]  ;;  %v1164_v58 = vld [vmem:[%s2464_s13 + $0x8] sm:$0xff]  ;;  %v1869_v60 = vor.u32 %v2047_v53, %v1868_v51  ;;  %v1796_v62 = vld [vmem:[#allocation5 + $0x20] sm:$0xf]  ;;  %v1809_v1 = vor.u32 %v2030_v56, %v1806_v57  ;;  %s1616_s21 = sshll.u32 %s2811_s12, 4  ;;  %s1617_s21 = int_to_ptr.vmem [resolvable:$true] %s1616_s21 }
  0x39   : > { %733 = vmatpush.bf16.msra.mxu0 %v1813_v46  ;;  %v1933_v61 = vor.u32 %v2063_v55, %v1932_v54  ;;  %v2029_v63 = vld [vmem:[#allocation5 + $0x24] sm:$0xf0]  ;;  %v1860_v0 = vld [vmem:[#allocation5 + $0xa0] sm:$0xf]  ;;  %v2028_v5 = vld [vmem:[#allocation5 + $0x24] sm:$0xf] }
  0x3a   : > { %782 = vmatpush.bf16.msra.mxu1 %v1877_v47  ;;  %v2045_v2 = vld [vmem:[#allocation5 + $0xa4] sm:$0xf0]  ;;  %v1924_v3 = vld [vmem:[#allocation5 + $0x120] sm:$0xf]  ;;  %v1798_v6 = vld [vmem:[#allocation5 + $0x28] sm:$0xf0]  ;;  %v1797_v7 = vor.u32 %v2029_v63, %v1796_v62 }
  0x3b   : > { %831 = vmatpush.bf16.msra.mxu2 %v1941_v48  ;;  %880 = vmatpush.bf16.msra.mxu3 %v1817_v52  ;;  %v2061_v4 = vld [vmem:[#allocation5 + $0x124] sm:$0xf0]  ;;  %v1788_v8 = vld [vmem:[#allocation5 + $0x10] sm:$0xf]  ;;  %v1861_v9 = vor.u32 %v2045_v2, %v1860_v0  ;;  %v2027_v11 = vld [vmem:[#allocation5 + $0x14] sm:$0xf0]  ;;  %v1801_v14 = vor.u32 %v2028_v5, %v1798_v6 }
  0x3c   : > { %1185 = vperm.xlu0 %2158, %v1164_v58   ;;  %v1925_v10 = vor.u32 %v2061_v4, %v1924_v3  ;;  %v1852_v12 = vld [vmem:[#allocation5 + $0x90] sm:$0xf]  ;;  %v2043_v13 = vld [vmem:[#allocation5 + $0x94] sm:$0xf0]  ;;  %v2026_v17 = vld [vmem:[#allocation5 + $0x14] sm:$0xf]  ;;  %v1789_v21 = vor.u32 %v2027_v11, %v1788_v8 }
  0x3d   : > { %734 = vmatpush.bf16.msra.mxu0 %v1805_v59  ;;  %v1916_v15 = vld [vmem:[#allocation5 + $0x110] sm:$0xf]  ;;  %v2059_v16 = vld [vmem:[#allocation5 + $0x114] sm:$0xf0]  ;;  %v1790_v18 = vld [vmem:[#allocation5 + $0x18] sm:$0xf0]  ;;  %v1853_v25 = vor.u32 %v2043_v13, %v1852_v12 }
  0x3e   : > { %783 = vmatpush.bf16.msra.mxu1 %v1869_v60  ;;  %v1169_v19 = vld [vmem:[%s2464_s13 + $0x30] sm:$0xff]  ;;  %v1780_v20 = vld [vmem:[#allocation5] sm:$0xf]  ;;  %v2025_v22 = vld [vmem:[#allocation5 + $0x4] sm:$0xf0]  ;;  %v1917_v26 = vor.u32 %v2059_v16, %v1916_v15  ;;  %v1793_v30 = vor.u32 %v2026_v17, %v1790_v18  ;;  %s1618_s26 = sshll.u32 %s1615_s8, 4  ;;  %s1619_s26 = int_to_ptr.hbm [resolvable:$true] %s1618_s26 }
  0x3f   : > { %832 = vmatpush.bf16.msra.mxu2 %v1933_v61  ;;  %881 = vmatpush.bf16.msra.mxu3 %v1809_v1  ;;  %v1844_v23 = vld [vmem:[#allocation5 + $0x80] sm:$0xf]  ;;  %v2041_v24 = vld [vmem:[#allocation5 + $0x84] sm:$0xf0]  ;;  %v2024_v29 = vld [vmem:[#allocation5 + $0x4] sm:$0xf]  ;;  %v1781_v37 = vor.u32 %v2025_v22, %v1780_v20 }
  0x40   : > { %v1908_v27 = vld [vmem:[#allocation5 + $0x100] sm:$0xf]  ;;  %v2057_v28 = vld [vmem:[#allocation5 + $0x104] sm:$0xf0]  ;;  %v1782_v31 = vld [vmem:[#allocation5 + $0x8] sm:$0xf0]  ;;  %v1845_v41 = vor.u32 %v2041_v24, %v1844_v23 }
  0x41   : > { %735 = vmatpush.bf16.msra.mxu0 %v1797_v7  ;;  %v370_v32 = vld [vmem:[%s2445_s6] sm:$0xff]  ;;  %v1165_v33 = vld [vmem:[%s2464_s13 + $0x10] sm:$0xff]  ;;  %v373_v34 = vld [vmem:[%s2445_s6 + $0x18] sm:$0xff]  ;;  %v1909_v42 = vor.u32 %v2057_v28, %v1908_v27  ;;  %v1785_v46 = vor.u32 %v2024_v29, %v1782_v31  ;;  %s1601_s28 = scalar_lea.sflag [#allocation4], %s2441_s14  ;;  %s2241_s9 = scalar_lea.hbm %s2948_s5, 512 }
  0x42   : > { %784 = vmatpush.bf16.msra.mxu1 %v1861_v9  ;;  %v2054_v35 = vld [vmem:[#allocation5 + $0xf4] sm:$0xf]  ;;  %v1902_v36 = vld [vmem:[#allocation5 + $0xf8] sm:$0xf0]  ;;  %1188 = vperm.xlu1 %2159, %v1165_v33   ;;  %v371_v38 = vld [vmem:[%s2445_s6 + $0x8] sm:$0xff]  ;;  %v418_v48 = vpack.c.bf16 %v373_v34, %v370_v32 }
  0x43   : > { %833 = vmatpush.bf16.msra.mxu2 %v1925_v10  ;;  %882 = vmatpush.bf16.msra.mxu3 %v1801_v14  ;;  %v2070_v39 = vld [vmem:[#allocation5 + $0x174] sm:$0xf]  ;;  %v1966_v40 = vld [vmem:[#allocation5 + $0x178] sm:$0xf0]  ;;  %v374_v43 = vld [vmem:[%s2445_s6 + $0x20] sm:$0xff]  ;;  %v1905_v47 = vor.u32 %v2054_v35, %v1902_v36 }
  0x44   : > { %1200 = vperm.xlu0 %2158, %v1169_v19   ;;  %v372_v44 = vld [vmem:[%s2445_s6 + $0x10] sm:$0xff]  ;;  %v375_v45 = vld [vmem:[%s2445_s6 + $0x28] sm:$0xff]  ;;  %v1969_v49 = vor.u32 %v2070_v39, %v1966_v40  ;;  %v2476_v50 = vpack.c.bf16 %v374_v43, %v371_v38  ;;  %v2052_v52 = vld [vmem:[#allocation5 + $0xe4] sm:$0xf] }
  0x45   : > { %736 = vmatpush.bf16.msra.mxu0 %v1789_v21  ;;  %v2478_v51 = vpack.c.bf16 %v375_v45, %v372_v44  ;;  %v1894_v53 = vld [vmem:[#allocation5 + $0xe8] sm:$0xf0]  ;;  %v2068_v54 = vld [vmem:[#allocation5 + $0x164] sm:$0xf]  ;;  %v1166_v60 = vld [vmem:[%s2464_s13 + $0x18] sm:$0xff] }
  0x46   : > { %785 = vmatpush.bf16.msra.mxu1 %v1853_v25  ;;  %v1958_v55 = vld [vmem:[#allocation5 + $0x168] sm:$0xf0]  ;;  %v1285_v57 = vld [vmem:[%s2946_s3 + $0x40] sm:$0xff]  ;;  %v1897_v59 = vor.u32 %v2052_v52, %v1894_v53  ;;  %v2050_v62 = vld [vmem:[#allocation5 + $0xd4] sm:$0xf] }
  0x47   : > { %834 = vmatpush.bf16.msra.mxu2 %v1917_v26  ;;  %883 = vmatpush.bf16.msra.mxu3 %v1793_v30  ;;  %v1172_v56 = vld [vmem:[%s2464_s13 + $0x48] sm:$0xff]  ;;  %v1961_v61 = vor.u32 %v2068_v54, %v1958_v55  ;;  %v1886_v63 = vld [vmem:[#allocation5 + $0xd8] sm:$0xf0]  ;;  %v2066_v0 = vld [vmem:[#allocation5 + $0x154] sm:$0xf] }
  0x48   : > { %v1286_v58 = vld [vmem:[%s2946_s3 + $0x48] sm:$0xff]  ;;  %v1950_v1 = vld [vmem:[#allocation5 + $0x158] sm:$0xf0]  ;;  %v1283_v2 = vld [vmem:[%s2946_s3 + $0x30] sm:$0xff]  ;;  %v1889_v4 = vor.u32 %v2050_v62, %v1886_v63 }
  0x49   : > { %737 = vmatpush.bf16.msra.mxu0 %v1781_v37  ;;  %v1284_v3 = vld [vmem:[%s2946_s3 + $0x38] sm:$0xff]  ;;  %v1167_v5 = vld [vmem:[%s2464_s13 + $0x20] sm:$0xff]  ;;  %v1953_v6 = vor.u32 %v2066_v0, %v1950_v1  ;;  %v376_v8 = vld [vmem:[%s2445_s6 + $0x30] sm:$0xff] }
  0x4a   : > { %786 = vmatpush.bf16.msra.mxu1 %v1845_v41  ;;  %1191 = vperm.xlu1 %2159, %v1166_v60   ;;  %v1175_v7 = vld [vmem:[%s2464_s13 + $0x60] sm:$0xff]  ;;  %v379_v9 = vld [vmem:[%s2445_s6 + $0x48] sm:$0xff]  ;;  %v377_v10 = vld [vmem:[%s2445_s6 + $0x38] sm:$0xff] }
  0x4b   : > { %835 = vmatpush.bf16.msra.mxu2 %v1909_v42  ;;  %884 = vmatpush.bf16.msra.mxu3 %v1785_v46  ;;  %v1170_v11 = vld [vmem:[%s2464_s13 + $0x38] sm:$0xff]  ;;  %v380_v12 = vld [vmem:[%s2445_s6 + $0x50] sm:$0xff]  ;;  %v378_v13 = vld [vmem:[%s2445_s6 + $0x40] sm:$0xff]  ;;  %v421_v15 = vpack.c.bf16 %v379_v9, %v376_v8 }
  0x4c   : > { %738 = vmatmul.bf16.vlgmr.msra.gmra.mxu0 %v418_v48  ;;  %1209 = vperm.xlu0 %2158, %v1172_v56   ;;  %v381_v14 = vld [vmem:[%s2445_s6 + $0x58] sm:$0xff]  ;;  %v2505_v16 = vpack.c.bf16 %v380_v12, %v377_v10  ;;  %v1173_v19 = vld [vmem:[%s2464_s13 + $0x50] sm:$0xff]  ;;  %v1168_v20 = vld [vmem:[%s2464_s13 + $0x28] sm:$0xff] }
  0x4d   : > { %926 = vmatpush.bf16.msrb.mxu0 %v1905_v47  ;;  %787 = vmatmul.bf16.vlgmr.msra.gmra.mxu1 %v2476_v50  ;;  %v2507_v17 = vpack.c.bf16 %v381_v14, %v378_v13  ;;  %v1178_v18 = vld [vmem:[%s2464_s13 + $0x78] sm:$0xff]  ;;  %v2048_v21 = vld [vmem:[#allocation5 + $0xc4] sm:$0xf]  ;;  %v1878_v22 = vld [vmem:[#allocation5 + $0xc8] sm:$0xf0] }
  0x4e   : > { %975 = vmatpush.bf16.msrb.mxu1 %v1969_v49  ;;  %836 = vmatmul.bf16.vlgmr.msra.gmra.mxu2 %v2478_v51  ;;  %v2064_v23 = vld [vmem:[#allocation5 + $0x144] sm:$0xf]  ;;  %v1881_v24 = vor.u32 %v2048_v21, %v1878_v22  ;;  %v1942_v25 = vld [vmem:[#allocation5 + $0x148] sm:$0xf0]  ;;  %v385_v31 = vld [vmem:[%s2445_s6 + $0x78] sm:$0xff] }
  0x4f   : > { %885 = vmatmul.bf16.vlgmr.msra.gmra.mxu3 %v418_v48  ;;  %1347 = vmatpush.msrb.mxu2 %v1285_v57  ;;  %v1281_v26 = vld [vmem:[%s2946_s3 + $0x20] sm:$0xff]  ;;  %v1945_v27 = vor.u32 %v2064_v23, %v1942_v25  ;;  %v1282_v28 = vld [vmem:[%s2946_s3 + $0x28] sm:$0xff]  ;;  %v384_v35 = vld [vmem:[%s2445_s6 + $0x70] sm:$0xff] }
  0x50   : > { %1412 = vmatpush.msrb.mxu3 %v1286_v58  ;;  %1194 = vperm.xlu2 %2160, %v1167_v5   ;;  %v382_v29 = vld [vmem:[%s2445_s6 + $0x60] sm:$0xff]  ;;  %v383_v32 = vld [vmem:[%s2445_s6 + $0x68] sm:$0xff]  ;;  %v1174_v40 = vld [vmem:[%s2464_s13 + $0x58] sm:$0xff] }
  0x51   : > { %927 = vmatpush.bf16.msrb.mxu0 %v1897_v59  ;;  %1348 = vmatpush.msrb.mxu2 %v1283_v2  ;;  %v1171_v30 = vld [vmem:[%s2464_s13 + $0x40] sm:$0xff]  ;;  %v1176_v33 = vld [vmem:[%s2464_s13 + $0x68] sm:$0xff]  ;;  %v424_v37 = vpack.c.bf16 %v385_v31, %v382_v29  ;;  %v2046_v41 = vld [vmem:[#allocation5 + $0xb4] sm:$0xf] }
  0x52   : > { %976 = vmatpush.bf16.msrb.mxu1 %v1961_v61  ;;  %1413 = vmatpush.msrb.mxu3 %v1284_v3  ;;  %v386_v34 = vld [vmem:[%s2445_s6 + $0x80] sm:$0xff]  ;;  %v387_v36 = vld [vmem:[%s2445_s6 + $0x88] sm:$0xff]  ;;  %v1870_v42 = vld [vmem:[#allocation5 + $0xb8] sm:$0xf0] }
  0x53   : > { %1203 = vperm.xlu1 %2159, %v1170_v11   ;;  %1349 = vmatpush.msrb.mxu2 %v1281_v26  ;;  %v2528_v38 = vpack.c.bf16 %v386_v34, %v383_v32  ;;  %v2530_v39 = vpack.c.bf16 %v387_v36, %v384_v35  ;;  %v2062_v43 = vld [vmem:[#allocation5 + $0x134] sm:$0xf]  ;;  %v1873_v44 = vor.u32 %v2046_v41, %v1870_v42  ;;  %v1934_v45 = vld [vmem:[#allocation5 + $0x138] sm:$0xf0]  ;;  %v391_v49 = vld [vmem:[%s2445_s6 + $0xa8] sm:$0xff] }
  0x54   : > { %1218 = vperm.xlu0 %2158, %v1175_v7   ;;  %1414 = vmatpush.msrb.mxu3 %v1282_v28  ;;  %v1937_v46 = vor.u32 %v2062_v43, %v1934_v45  ;;  %v1177_v47 = vld [vmem:[%s2464_s13 + $0x70] sm:$0xff]  ;;  %v389_v52 = vld [vmem:[%s2445_s6 + $0x98] sm:$0xff]  ;;  %v390_v54 = vld [vmem:[%s2445_s6 + $0xa0] sm:$0xff]  ;;  %s2235_s13 = sshra.s32 %s1619_s26, 4  ;;  %s2236_s13 = int_to_ptr.hbm [resolvable:$true] %s2235_s13 }
  0x55   : > { %928 = vmatpush.bf16.msrb.mxu0 %v1889_v4  ;;  %v388_v48 = vld [vmem:[%s2445_s6 + $0x90] sm:$0xff]  ;;  %v393_v55 = vld [vmem:[%s2445_s6 + $0xb8] sm:$0xff]  ;;  %v2044_v59 = vld [vmem:[#allocation5 + $0xa4] sm:$0xf]  ;;  %s2237_s17 = scalar_lea.hbm %s2236_s13, 256  ;;  %p2242_p12 = scmp.lt.s32.totalorder %s2236_s13, %s2948_s5 }
  0x56   : > { %977 = vmatpush.bf16.msrb.mxu1 %v1953_v6  ;;  %v392_v53 = vld [vmem:[%s2445_s6 + $0xb0] sm:$0xff]  ;;  %v427_v56 = vpack.c.bf16 %v391_v49, %v388_v48  ;;  %v2544_v58 = vpack.c.bf16 %v393_v55, %v390_v54  ;;  %v1862_v60 = vld [vmem:[#allocation5 + $0xa8] sm:$0xf0]  ;;  %v2060_v61 = vld [vmem:[#allocation5 + $0x124] sm:$0xf]  ;;  %p2238_p1 = scmp.ne.s32.totalorder %s2236_s13, %s2237_s17  ;;  %p2243_p13 = scmp.lt.s32.totalorder %s2241_s9, %s2237_s17 }
  0x57   : > { %v2542_v57 = vpack.c.bf16 %v392_v53, %v389_v52  ;;  %v1865_v62 = vor.u32 %v2044_v59, %v1862_v60  ;;  %v1926_v63 = vld [vmem:[#allocation5 + $0x128] sm:$0xf0]  ;;  %v1279_v0 = vld [vmem:[%s2946_s3 + $0x10] sm:$0xff]  ;;  %v1280_v1 = vld [vmem:[%s2946_s3 + $0x18] sm:$0xff] }
  0x58   : > { %1197 = vperm.xlu2 %2160, %v1168_v20   ;;  %v1929_v2 = vor.u32 %v2060_v61, %v1926_v63  ;;  %1350 = vmatpush.msrb.mxu2 %v1279_v0  ;;  %v394_v3 = vld [vmem:[%s2445_s6 + $0xc0] sm:$0xff]  ;;  %v397_v4 = vld [vmem:[%s2445_s6 + $0xd8] sm:$0xff]  ;;  %v395_v5 = vld [vmem:[%s2445_s6 + $0xc8] sm:$0xff]  ;;  %v1179_v0 = vlaneseq  ;;  %p2239_p4 = pnand %p2238_p1, %p2423_p5  ;;  %p2244_p0 = por %p2243_p13, %p2242_p12 }
  0x59   : > { %929 = vmatpush.bf16.msrb.mxu0 %v1881_v24  ;;  %1415 = vmatpush.msrb.mxu3 %v1280_v1  ;;  %v398_v6 = vld [vmem:[%s2445_s6 + $0xe0] sm:$0xff]  ;;  %v396_v7 = vld [vmem:[%s2445_s6 + $0xd0] sm:$0xff]  ;;  %v399_v8 = vld [vmem:[%s2445_s6 + $0xe8] sm:$0xff]  ;;  %v430_v9 = vpack.c.bf16 %v397_v4, %v394_v3 }
  0x5a   : > { %978 = vmatpush.bf16.msrb.mxu1 %v1945_v27  ;;  %v2560_v10 = vpack.c.bf16 %v398_v6, %v395_v5  ;;  %v2562_v11 = vpack.c.bf16 %v399_v8, %v396_v7  ;;  %v2042_v12 = vld [vmem:[#allocation5 + $0x94] sm:$0xf]  ;;  %v1854_v13 = vld [vmem:[#allocation5 + $0x98] sm:$0xf0]  ;;  %v403_v21 = vld [vmem:[%s2445_s6 + $0x108] sm:$0xff]  ;;  %v2612_v4 = vand.u32 127, %v1179_v0  ;;  %p2240_p8 = pneg %p2239_p4 }
  0x5b   : > { %1212 = vperm.xlu1 %2159, %v1173_v19   ;;  %v2058_v14 = vld [vmem:[#allocation5 + $0x114] sm:$0xf]  ;;  %v401_v22 = vld [vmem:[%s2445_s6 + $0xf8] sm:$0xff]  ;;  %v402_v24 = vld [vmem:[%s2445_s6 + $0x100] sm:$0xff]  ;;  %v2315_v7 = vmov 0.0  }
  0x5c   : > { %743 = vmatmul.bf16.gmra.mxu0 %v421_v15  ;;  %1227 = vperm.xlu0 %2158, %v1178_v18   ;;  %v1918_v18 = vld [vmem:[#allocation5 + $0x118] sm:$0xf0]  ;;  %v400_v20 = vld [vmem:[%s2445_s6 + $0xf0] sm:$0xff]  ;;  %v1277_v26 = vld [vmem:[%s2946_s3] sm:$0xff]  ;;  %p2245_p3 = pnand %p2244_p0, %p2240_p8 }
  0x5d   : > { %792 = vmatmul.bf16.gmra.mxu1 %v2505_v16  ;;  %930 = vmatpush.bf16.msrb.mxu0 %v1873_v44  ;;  %v1921_v19 = vor.u32 %v2058_v14, %v1918_v18  ;;  %v404_v23 = vld [vmem:[%s2445_s6 + $0x110] sm:$0xff]  ;;  %v405_v25 = vld [vmem:[%s2445_s6 + $0x118] sm:$0xff]  ;;  %v1278_v27 = vld [vmem:[%s2946_s3 + $0x8] sm:$0xff]  ;;  %v433_v28 = vpack.c.bf16 %v403_v21, %v400_v20 }
  0x5e   : > { %841 = vmatmul.bf16.gmra.mxu2 %v2507_v17  ;;  %979 = vmatpush.bf16.msrb.mxu1 %v1937_v46  ;;  %v2578_v29 = vpack.c.bf16 %v404_v23, %v401_v22  ;;  %v2040_v31 = vld [vmem:[#allocation5 + $0x84] sm:$0xf]  ;;  %v1846_v32 = vld [vmem:[#allocation5 + $0x88] sm:$0xf0]  ;;  %v409_v41 = vld [vmem:[%s2445_s6 + $0x138] sm:$0xff] }
  0x5f   : > { %890 = vmatmul.bf16.gmra.mxu3 %v421_v15  ;;  %v1857_v15 = vor.u32 %v2042_v12, %v1854_v13  ;;  %1351 = vmatpush.msrb.mxu2 %v1277_v26  ;;  %v1849_v34 = vor.u32 %v2040_v31, %v1846_v32  ;;  %v1910_v35 = vld [vmem:[#allocation5 + $0x108] sm:$0xf0]  ;;  %v410_v43 = vld [vmem:[%s2445_s6 + $0x140] sm:$0xff]  ;;  %v408_v44 = vld [vmem:[%s2445_s6 + $0x130] sm:$0xff] }
  0x60   : > { %1206 = vperm.xlu2 %2160, %v1171_v30   ;;  %1416 = vmatpush.msrb.mxu3 %v1278_v27  ;;  %v2580_v30 = vpack.c.bf16 %v405_v25, %v402_v24  ;;  %v407_v42 = vld [vmem:[%s2445_s6 + $0x128] sm:$0xff]  ;;  %v412_v53 = vld [vmem:[%s2445_s6 + $0x150] sm:$0xff]  ;;  %v413_v55 = vld [vmem:[%s2445_s6 + $0x158] sm:$0xff] }
  0x61   : > { %931 = vmatpush.bf16.msrb.mxu0 %v1865_v62  ;;  %v411_v45 = vld [vmem:[%s2445_s6 + $0x148] sm:$0xff]  ;;  %v416_v59 = vld [vmem:[%s2445_s6 + $0x170] sm:$0xff]  ;;  %v414_v60 = vld [vmem:[%s2445_s6 + $0x160] sm:$0xff] }
  0x62   : > { %980 = vmatpush.bf16.msrb.mxu1 %v1929_v2  ;;  %v2592_v48 = vpack.c.bf16 %v411_v45, %v408_v44  ;;  %v415_v54 = vld [vmem:[%s2445_s6 + $0x168] sm:$0xff]  ;;  %v417_v61 = vld [vmem:[%s2445_s6 + $0x178] sm:$0xff]  ;;  %v2606_v1 = vpack.c.bf16 %v416_v59, %v413_v55 }
  0x63   : > { %1221 = vperm.xlu1 %2159, %v1176_v33   ;;  %v2056_v33 = vld [vmem:[#allocation5 + $0x104] sm:$0xf]  ;;  %v439_v62 = vpack.c.bf16 %v415_v54, %v412_v53  ;;  %v2608_v2 = vpack.c.bf16 %v417_v61, %v414_v60 }
  0x64   : > { %v1913_v36 = vor.u32 %v2056_v33, %v1910_v35 }
  0x65   : > { %932 = vmatpush.bf16.msrb.mxu0 %v1857_v15 }
  0x66   : > { %981 = vmatpush.bf16.msrb.mxu1 %v1921_v19 }
  0x68   : > { %1215 = vperm.xlu2 %2160, %v1174_v40   ;;  %v406_v40 = vld [vmem:[%s2445_s6 + $0x120] sm:$0xff] }
  0x69   : > { %933 = vmatpush.bf16.msrb.mxu0 %v1849_v34  ;;  %v436_v46 = vpack.c.bf16 %v409_v41, %v406_v40 }
  0x6a   : > { %982 = vmatpush.bf16.msrb.mxu1 %v1913_v36 }
  0x6c   : > { %748 = vmatmul.bf16.gmra.mxu0 %v424_v37 }
  0x6d   : > { %797 = vmatmul.bf16.gmra.mxu1 %v2528_v38 }
  0x6e   : > { %846 = vmatmul.bf16.gmra.mxu2 %v2530_v39 }
  0x6f   : > { %895 = vmatmul.bf16.gmra.mxu3 %v424_v37 }
  0x70   : > { %1224 = vperm.xlu2 %2160, %v1177_v47   ;;  %v2590_v47 = vpack.c.bf16 %v410_v43, %v407_v42 }
  0x7c   : > { %753 = vmatmul.bf16.gmra.mxu0 %v427_v56 }
  0x7d   : > { %802 = vmatmul.bf16.gmra.mxu1 %v2542_v57 }
  0x7e   : > { %851 = vmatmul.bf16.gmra.mxu2 %v2544_v58 }
  0x7f   : > { %900 = vmatmul.bf16.gmra.mxu3 %v427_v56 }
  0x8c   : > { %758 = vmatmul.bf16.gmra.mxu0 %v430_v9 }
  0x8d   : > { %807 = vmatmul.bf16.gmra.mxu1 %v2560_v10 }
  0x8e   : > { %856 = vmatmul.bf16.gmra.mxu2 %v2562_v11 }
  0x8f   : > { %905 = vmatmul.bf16.gmra.mxu3 %v430_v9 }
  0x9c   : > { %763 = vmatmul.bf16.gmra.mxu0 %v433_v28 }
  0x9d   : > { %812 = vmatmul.bf16.gmra.mxu1 %v2578_v29 }
  0x9e   : > { %861 = vmatmul.bf16.gmra.mxu2 %v2580_v30 }
  0x9f   : > { %910 = vmatmul.bf16.gmra.mxu3 %v433_v28 }
  0xa6   : > { %v1183_v37 = vpop.permute.xlu0 %1182 }
  0xa7   : > { %vm1229_vm2 = vcmp.eq.s32.totalorder %v2612_v4, %v1183_v37 }
  0xa8   : > { %v1970_v18 = vsel %vm1229_vm2, 1.0, %v2315_v7 }
  0xaa   : > { %v2596_v52 = vpop.permute.xlu2 %1194 }
  0xab   : > { %vm1233_vm13 = vcmp.eq.s32.totalorder %v2612_v4, %v2596_v52 }
  0xac   : > { %768 = vmatmul.bf16.gmra.mxu0 %v436_v46 }
  0xad   : > { %817 = vmatmul.bf16.gmra.mxu1 %v2590_v47 }
  0xae   : > { %866 = vmatmul.bf16.gmra.mxu2 %v2592_v48  ;;  %v1186_v49 = vpop.permute.xlu0 %1185 }
  0xaf   : > { %915 = vmatmul.bf16.gmra.mxu3 %v436_v46  ;;  %vm1230_vm6 = vcmp.eq.s32.totalorder %v2612_v4, %v1186_v49 }
  0xb0   : > { %v1971_v34 = vsel %vm1230_vm6, 1.0, %v2315_v7 }
  0xb2   : > { %v2610_v3 = vpop.permute.xlu2 %1197 }
  0xb3   : > { %vm1234_vm14 = vcmp.eq.s32.totalorder %v2612_v4, %v2610_v3 }
  0xb4   : > { %v1189_v63 = vpop.permute.xlu1 %1188 }
  0xb5   : > { %vm1231_vm10 = vcmp.eq.s32.totalorder %v2612_v4, %v1189_v63 }
  0xb6   : > { %v2601_v56 = vpop.permute.xlu0 %1200  ;;  %v1972_v43 = vsel %vm1231_vm10, 1.0, %v2315_v7 }
  0xb7   : > { %vm1235_vm15 = vcmp.eq.s32.totalorder %v2612_v4, %v2601_v56 }
  0xba   : > { %v1207_v6 = vpop.permute.xlu2 %1206 }
  0xbb   : > { %vm1237_vm1 = vcmp.eq.s32.totalorder %v2612_v4, %v1207_v6 }
  0xbc   : > { %773 = vmatmul.bf16.gmra.mxu0 %v439_v62  ;;  %v1192_v9 = vpop.permute.xlu1 %1191  ;;  %v2622_v12 = vsel %vm1237_vm1, 1.0, %v2315_v7 }
  0xbd   : > { %822 = vmatmul.bf16.gmra.mxu1 %v2606_v1  ;;  %vm1232_vm12 = vcmp.eq.s32.totalorder %v2612_v4, %v1192_v9 }
  0xbe   : > { %871 = vmatmul.bf16.gmra.mxu2 %v2608_v2  ;;  %v1210_v5 = vpop.permute.xlu0 %1209 }
  0xbf   : > { %920 = vmatmul.bf16.gmra.mxu3 %v439_v62  ;;  %vm1238_vm0 = vcmp.eq.s32.totalorder %v2612_v4, %v1210_v5  ;;  %v1974_v5 = vsel %vm1233_vm13, 1.0, %v2315_v7 }
  0xc0   : > { %v2618_v8 = vsel %vm1238_vm0, 1.0, %v2315_v7 }
  0xc2   : > { %v1216_v15 = vpop.permute.xlu2 %1215 }
  0xc3   : > { %vm1240_vm5 = vcmp.eq.s32.totalorder %v2612_v4, %v1216_v15 }
  0xc4   : > { %v2634_v23 = vsel %vm1240_vm5, 1.0, %v2315_v7 }
  0xc5   : > { %v2630_v21 = vpop.permute.xlu1 %1203 }
  0xc6   : > { %v1219_v13 = vpop.permute.xlu0 %1218  ;;  %vm1236_vm0 = vcmp.eq.s32.totalorder %v2612_v4, %v2630_v21 }
  0xc7   : > { %vm1241_vm3 = vcmp.eq.s32.totalorder %v2612_v4, %v1219_v13 }
  0xc8   : > { %v2628_v19 = vsel %vm1241_vm3, 1.0, %v2315_v7 }
  0xc9   : > { %v739_v14 = vpop.f32.mrf.mxu0 }
  0xca   : > { %v788_v20 = vpop.f32.mrf.mxu1  ;;  %v1225_v33 = vpop.permute.xlu2 %1224 }
  0xcb   : > { %v789_v22 = vadd.f32 %v788_v20, %v739_v14  ;;  %vm1243_vm9 = vcmp.eq.s32.totalorder %v2612_v4, %v1225_v33 }
  0xcc   : > { %934 = vmatmul.bf16.vlgmr.msrb.gmra.mxu0 %v2476_v50  ;;  %v2657_v36 = vsel %vm1243_vm9, 1.0, %v2315_v7 }
  0xcd   : > { %983 = vmatmul.bf16.vlgmr.msrb.gmra.mxu1 %v2478_v51  ;;  %v1213_v51 = vpop.permute.xlu1 %1212 }
  0xce   : > { %1986 = vmatmul.msk.f32.vlgmr.msrb.gmra.mxu2 %vm1287_vm4, %v1970_v18  ;;  %v1228_v25 = vpop.permute.xlu0 %1227  ;;  %vm1239_vm8 = vcmp.eq.s32.totalorder %v2612_v4, %v1213_v51 }
  0xcf   : > { %2002 = vmatmul.msk.f32.vlgmr.msrb.gmra.mxu3 %vm1287_vm4, %v1970_v18  ;;  %vm1244_vm7 = vcmp.eq.s32.totalorder %v2612_v4, %v1228_v25  ;;  %v2652_v35 = vsel %vm1239_vm8, 1.0, %v2315_v7 }
  0xd0   : > { %v2647_v31 = vsel %vm1244_vm7, 1.0, %v2315_v7 }
  0xd1   : > { %v837_v24 = vpop.f32.mrf.mxu2  ;;  %v741_v28 = vpop.f32.mrf.mxu0 }
  0xd2   : > { %v2641_v26 = vadd.f32 %v837_v24, %v789_v22  ;;  %v2643_v27 = vpop.f32.mrf.mxu3  ;;  %v790_v50 = vpop.f32.mrf.mxu1  ;;  %v1975_v22 = vsel %vm1234_vm14, 1.0, %v2315_v7 }
  0xd3   : > { %v791_v32 = vadd.f32 %v790_v50, %v741_v28  ;;  %v1976_v50 = vsel %vm1235_vm15, 1.0, %v2315_v7 }
  0xd5   : > { %v1222_v45 = vpop.permute.xlu1 %1221 }
  0xd6   : > { %1987 = vmatmul.msk.f32.gmra.mxu2 %vm1287_vm4, %v1971_v34  ;;  %vm1242_vm11 = vcmp.eq.s32.totalorder %v2612_v4, %v1222_v45 }
  0xd7   : > { %2003 = vmatmul.msk.f32.gmra.mxu3 %vm1287_vm4, %v1971_v34  ;;  %v2669_v49 = vsel %vm1242_vm11, 1.0, %v2315_v7 }
  0xd9   : > { %v839_v37 = vpop.f32.mrf.mxu2  ;;  %v744_v42 = vpop.f32.mrf.mxu0 }
  0xda   : > { %v2661_v40 = vadd.f32 %v839_v37, %v791_v32  ;;  %v2663_v41 = vpop.f32.mrf.mxu3  ;;  %v793_v44 = vpop.f32.mrf.mxu1 }
  0xdb   : > { %v794_v46 = vadd.f32 %v793_v44, %v744_v42  ;;  %v1977_v42 = vsel %vm1236_vm0, 1.0, %v2315_v7 }
  0xdc   : > { %939 = vmatmul.bf16.gmra.mxu0 %v2505_v16  ;;  %v1973_v16 = vsel %vm1232_vm12, 1.0, %v2315_v7 }
  0xdd   : > { %988 = vmatmul.bf16.gmra.mxu1 %v2507_v17 }
  0xde   : > { %1988 = vmatmul.msk.f32.gmra.mxu2 %vm1287_vm4, %v1972_v43 }
  0xdf   : > { %2004 = vmatmul.msk.f32.gmra.mxu3 %vm1287_vm4, %v1972_v43 }
  0xe1   : > { %v842_v53 = vpop.f32.mrf.mxu2  ;;  %v746_v59 = vpop.f32.mrf.mxu0 }
  0xe2   : > { %v2675_v54 = vadd.f32 %v842_v53, %v794_v46  ;;  %v2677_v55 = vpop.f32.mrf.mxu3  ;;  %v795_v60 = vpop.f32.mrf.mxu1 }
  0xe3   : > { %v796_v61 = vadd.f32 %v795_v60, %v746_v59 }
  0xe6   : > { %1989 = vmatmul.msk.f32.gmra.mxu2 %vm1287_vm4, %v1973_v16 }
  0xe7   : > { %2005 = vmatmul.msk.f32.gmra.mxu3 %vm1287_vm4, %v1973_v16 }
  0xe9   : > { %v844_v17 = vpop.f32.mrf.mxu2  ;;  %v749_v0 = vpop.f32.mrf.mxu0 }
  0xea   : > { %v2684_v62 = vadd.f32 %v844_v17, %v796_v61  ;;  %v2686_v63 = vpop.f32.mrf.mxu3  ;;  %v798_v6 = vpop.f32.mrf.mxu1 }
  0xeb   : > { %v799_v9 = vadd.f32 %v798_v6, %v749_v0 }
  0xec   : > { %944 = vmatmul.bf16.gmra.mxu0 %v2528_v38 }
  0xed   : > { %993 = vmatmul.bf16.gmra.mxu1 %v2530_v39 }
  0xee   : > { %1990 = vmatmul.msk.f32.gmra.mxu2 %vm1287_vm4, %v1974_v5 }
  0xef   : > { %2006 = vmatmul.msk.f32.gmra.mxu3 %vm1287_vm4, %v1974_v5 }
  0xf1   : > { %v847_v13 = vpop.f32.mrf.mxu2  ;;  %v751_v15 = vpop.f32.mrf.mxu0 }
  0xf2   : > { %v2695_v52 = vadd.f32 %v847_v13, %v799_v9  ;;  %v2697_v14 = vpop.f32.mrf.mxu3  ;;  %v800_v18 = vpop.f32.mrf.mxu1 }
  0xf3   : > { %v801_v20 = vadd.f32 %v800_v18, %v751_v15 }
  0xf6   : > { %1991 = vmatmul.msk.f32.gmra.mxu2 %vm1287_vm4, %v1975_v22 }
  0xf7   : > { %2007 = vmatmul.msk.f32.gmra.mxu3 %vm1287_vm4, %v1975_v22 }
  0xf9   : > { %v849_v38 = vpop.f32.mrf.mxu2  ;;  %v754_v24 = vpop.f32.mrf.mxu0 }
  0xfa   : > { %v2704_v39 = vadd.f32 %v849_v38, %v801_v20  ;;  %v2706_v3 = vpop.f32.mrf.mxu3  ;;  %v803_v25 = vpop.f32.mrf.mxu1 }
  0xfb   : > { %v804_v28 = vadd.f32 %v803_v25, %v754_v24 }
  0xfc   : > { %949 = vmatmul.bf16.gmra.mxu0 %v2542_v57 }
  0xfd   : > { %998 = vmatmul.bf16.gmra.mxu1 %v2544_v58 }
  0xfe   : > { %1992 = vmatmul.msk.f32.gmra.mxu2 %vm1287_vm4, %v1976_v50 }
  0xff   : > { %2008 = vmatmul.msk.f32.gmra.mxu3 %vm1287_vm4, %v1976_v50 }
 0x101   : > { %v852_v51 = vpop.f32.mrf.mxu2  ;;  %v756_v33 = vpop.f32.mrf.mxu0 }
 0x102   : > { %v2715_v56 = vadd.f32 %v852_v51, %v804_v28  ;;  %v2717_v32 = vpop.f32.mrf.mxu3  ;;  %v805_v34 = vpop.f32.mrf.mxu1 }
 0x103   : > { %v806_v37 = vadd.f32 %v805_v34, %v756_v33 }
 0x106   : > { %1993 = vmatmul.msk.f32.gmra.mxu2 %vm1287_vm4, %v1977_v42 }
 0x107   : > { %2009 = vmatmul.msk.f32.gmra.mxu3 %vm1287_vm4, %v1977_v42 }
 0x109   : > { %v854_v57 = vpop.f32.mrf.mxu2  ;;  %v759_v44 = vpop.f32.mrf.mxu0 }
 0x10a   : > { %v2722_v58 = vadd.f32 %v854_v57, %v806_v37  ;;  %v2724_v43 = vpop.f32.mrf.mxu3  ;;  %v808_v4 = vpop.f32.mrf.mxu1 }
 0x10b   : > { %v809_v21 = vadd.f32 %v808_v4, %v759_v44 }
 0x10c   : > { %954 = vmatmul.bf16.gmra.mxu0 %v2560_v10 }
 0x10d   : > { %1003 = vmatmul.bf16.gmra.mxu1 %v2562_v11 }
 0x10e   : > { %1994 = vmatmul.msk.f32.gmra.mxu2 %vm1287_vm4, %v2622_v12 }
 0x10f   : > { %2010 = vmatmul.msk.f32.gmra.mxu3 %vm1287_vm4, %v2622_v12 }
 0x111   : > { %v857_v7 = vpop.f32.mrf.mxu2  ;;  %v761_v53 = vpop.f32.mrf.mxu0 }
 0x112   : > { %v2732_v45 = vadd.f32 %v857_v7, %v809_v21  ;;  %v2734_v46 = vpop.f32.mrf.mxu3  ;;  %v810_v59 = vpop.f32.mrf.mxu1 }
 0x113   : > { %v811_v60 = vadd.f32 %v810_v59, %v761_v53 }
 0x116   : > { %1995 = vmatmul.msk.f32.gmra.mxu2 %vm1287_vm4, %v2618_v8 }
 0x117   : > { %2011 = vmatmul.msk.f32.gmra.mxu3 %vm1287_vm4, %v2618_v8 }
 0x119   : > { %v859_v10 = vpop.f32.mrf.mxu2  ;;  %v764_v12 = vpop.f32.mrf.mxu0 }
 0x11a   : > { %v2740_v11 = vadd.f32 %v859_v10, %v811_v60  ;;  %v2742_v61 = vpop.f32.mrf.mxu3  ;;  %v813_v16 = vpop.f32.mrf.mxu1 }
 0x11b   : > { %v814_v17 = vadd.f32 %v813_v16, %v764_v12 }
 0x11c   : > { %959 = vmatmul.bf16.gmra.mxu0 %v2578_v29 }
 0x11d   : > { %1008 = vmatmul.bf16.gmra.mxu1 %v2580_v30 }
 0x11e   : > { %1996 = vmatmul.msk.f32.gmra.mxu2 %vm1287_vm4, %v2652_v35 }
 0x11f   : > { %2012 = vmatmul.msk.f32.gmra.mxu3 %vm1287_vm4, %v2652_v35 }
 0x121   : > { %v862_v0 = vpop.f32.mrf.mxu2  ;;  %v766_v6 = vpop.f32.mrf.mxu0 }
 0x122   : > { %v2750_v8 = vadd.f32 %v862_v0, %v814_v17  ;;  %v2752_v5 = vpop.f32.mrf.mxu3  ;;  %v815_v9 = vpop.f32.mrf.mxu1 }
 0x123   : > { %v816_v13 = vadd.f32 %v815_v9, %v766_v6 }
 0x126   : > { %1997 = vmatmul.msk.f32.gmra.mxu2 %vm1287_vm4, %v2634_v23 }
 0x127   : > { %2013 = vmatmul.msk.f32.gmra.mxu3 %vm1287_vm4, %v2634_v23 }
 0x129   : > { %v864_v29 = vpop.f32.mrf.mxu2  ;;  %v769_v35 = vpop.f32.mrf.mxu0 }
 0x12a   : > { %v2758_v30 = vadd.f32 %v864_v29, %v816_v13  ;;  %v2760_v15 = vpop.f32.mrf.mxu3  ;;  %v818_v18 = vpop.f32.mrf.mxu1 }
 0x12b   : > { %v819_v20 = vadd.f32 %v818_v18, %v769_v35 }
 0x12c   : > { %964 = vmatmul.bf16.gmra.mxu0 %v2590_v47 }
 0x12d   : > { %1013 = vmatmul.bf16.gmra.mxu1 %v2592_v48 }
 0x12e   : > { %1998 = vmatmul.msk.f32.gmra.mxu2 %vm1287_vm4, %v2628_v19 }
 0x12f   : > { %2014 = vmatmul.msk.f32.gmra.mxu3 %vm1287_vm4, %v2628_v19 }
 0x131   : > { %v867_v22 = vpop.f32.mrf.mxu2  ;;  %v771_v24 = vpop.f32.mrf.mxu0 }
 0x132   : > { %v2768_v23 = vadd.f32 %v867_v22, %v819_v20  ;;  %v2770_v38 = vpop.f32.mrf.mxu3  ;;  %v820_v25 = vpop.f32.mrf.mxu1 }
 0x133   : > { %v821_v28 = vadd.f32 %v820_v25, %v771_v24 }
 0x136   : > { %1999 = vmatmul.msk.f32.gmra.mxu2 %vm1287_vm4, %v2669_v49 }
 0x137   : > { %2015 = vmatmul.msk.f32.gmra.mxu3 %vm1287_vm4, %v2669_v49 }
 0x139   : > { %v869_v47 = vpop.f32.mrf.mxu2  ;;  %v774_v19 = vpop.f32.mrf.mxu0 }
 0x13a   : > { %v2776_v48 = vadd.f32 %v869_v47, %v821_v28  ;;  %v2778_v50 = vpop.f32.mrf.mxu3  ;;  %v823_v51 = vpop.f32.mrf.mxu1 }
 0x13b   : > { %v824_v33 = vadd.f32 %v823_v51, %v774_v19 }
 0x13c   : > { %969 = vmatmul.bf16.gmra.mxu0 %v2606_v1 }
 0x13d   : > { %1018 = vmatmul.bf16.gmra.mxu1 %v2608_v2  ;;  %v1498_v2 = vld [vmem:[%s2945_s2] sm:$0x3] }
 0x13e   : > { %2000 = vmatmul.msk.f32.gmra.mxu2 %vm1287_vm4, %v2657_v36  ;;  %v2802_v59 = vperm.slane %v1498_v2, 1  ;;  %v2804_v60 = vperm.slane %v1498_v2, 0 }
 0x13f   : > { %2016 = vmatmul.msk.f32.gmra.mxu3 %vm1287_vm4, %v2657_v36 }
 0x140   : > { %v1504_v12 = vadd.f32 %v2804_v60, %v2641_v26  ;;  %v1506_v26 = vadd.f32 %v2804_v60, %v2661_v40  ;;  %v1508_v51 = vadd.f32 %v2804_v60, %v2675_v54 }
 0x141   : > { %v872_v34 = vpop.f32.mrf.mxu2  ;;  %v776_v42 = vpop.f32.mrf.mxu0 }
 0x142   : > { %v2786_v49 = vadd.f32 %v872_v34, %v824_v33  ;;  %v2788_v37 = vpop.f32.mrf.mxu3  ;;  %v825_v57 = vpop.f32.mrf.mxu1 }
 0x143   : > { %v826_v44 = vadd.f32 %v825_v57, %v776_v42 }
 0x146   : > { %2001 = vmatmul.msk.f32.gmra.mxu2 %vm1287_vm4, %v2647_v31 }
 0x147   : > { %2017 = vmatmul.msk.f32.gmra.mxu3 %vm1287_vm4, %v2647_v31 }
 0x149   : > { %v874_v1 = vpop.f32.mrf.mxu2  ;;  %v935_v21 = vpop.f32.mrf.mxu0 }
 0x14a   : > { %v2797_v36 = vadd.f32 %v874_v1, %v826_v44  ;;  %v2799_v4 = vpop.f32.mrf.mxu3  ;;  %v936_v7 = vadd.f32 %v935_v21, %v2643_v27  ;;  %v984_v53 = vpop.f32.mrf.mxu1  ;;  %v1510_v21 = vadd.f32 %v2804_v60, %v2684_v62 }
 0x14c   : > { %v985_v10 = vadd.f32 %v984_v53, %v936_v7 }
 0x14e   : > { %v1505_v31 = vadd.f32 %v2802_v59, %v985_v10 }
 0x151   : > { %v1353_v16 = vpop.f32.mrf.mxu2  ;;  %v937_v6 = vpop.f32.mrf.mxu0 }
 0x152   : > { %v1536_v17 = vmul.f32 %v1504_v12, %v1353_v16  ;;  %v1418_v0 = vpop.f32.mrf.mxu3  ;;  %v938_v13 = vadd.f32 %v937_v6, %v2663_v41  ;;  %v986_v27 = vpop.f32.mrf.mxu1 }
 0x153   : > { %v1537_v9 = vmul.f32 %v1505_v31, %v1418_v0  ;;  %v1512_v0 = vadd.f32 %v2804_v60, %v2695_v52 }
 0x154   : > { %1568 = vst [vmem:[%s2811_s12] sm:$0xff] %v1536_v17  ;;  %v987_v29 = vadd.f32 %v986_v27, %v938_v13 }
 0x155   : > { %1569 = vst [vmem:[%s2811_s12 + $0x8] sm:$0xff] %v1537_v9 }
 0x156   : > { %v1507_v35 = vadd.f32 %v2802_v59, %v987_v29 }
 0x159   : > { %v1356_v18 = vpop.f32.mrf.mxu2  ;;  %v940_v24 = vpop.f32.mrf.mxu0 }
 0x15a   : > { %v1538_v20 = vmul.f32 %v1506_v26, %v1356_v18  ;;  %v1421_v22 = vpop.f32.mrf.mxu3  ;;  %v941_v25 = vadd.f32 %v940_v24, %v2677_v55  ;;  %v989_v28 = vpop.f32.mrf.mxu1  ;;  %v1514_v18 = vadd.f32 %v2804_v60, %v2704_v39 }
 0x15b   : > { %v1539_v41 = vmul.f32 %v1507_v35, %v1421_v22 }
 0x15c   : > { %1570 = vst [vmem:[%s2811_s12 + $0x10] sm:$0xff] %v1538_v20  ;;  %v990_v47 = vadd.f32 %v989_v28, %v941_v25 }
 0x15d   : > { %1571 = vst [vmem:[%s2811_s12 + $0x18] sm:$0xff] %v1539_v41 }
 0x15e   : > { %v1509_v19 = vadd.f32 %v2802_v59, %v990_v47 }
 0x161   : > { %v1359_v33 = vpop.f32.mrf.mxu2  ;;  %v942_v42 = vpop.f32.mrf.mxu0 }
 0x162   : > { %v1540_v40 = vmul.f32 %v1508_v51, %v1359_v33  ;;  %v1424_v34 = vpop.f32.mrf.mxu3  ;;  %v943_v44 = vadd.f32 %v942_v42, %v2686_v63  ;;  %v991_v1 = vpop.f32.mrf.mxu1 }
 0x163   : > { %v1541_v57 = vmul.f32 %v1509_v19, %v1424_v34  ;;  %v1516_v19 = vadd.f32 %v2804_v60, %v2715_v56 }
 0x164   : > { %1572 = vst [vmem:[%s2811_s12 + $0x20] sm:$0xff] %v1540_v40  ;;  %v992_v55 = vadd.f32 %v991_v1, %v943_v44  ;;  %v1518_v1 = vadd.f32 %v2804_v60, %v2722_v58 }
 0x165   : > { %1573 = vst [vmem:[%s2811_s12 + $0x28] sm:$0xff] %v1541_v57 }
 0x166   : > { %v1511_v2 = vadd.f32 %v2802_v59, %v992_v55 }
 0x169   : > { %v1362_v7 = vpop.f32.mrf.mxu2  ;;  %v945_v10 = vpop.f32.mrf.mxu0 }
 0x16a   : > { %v1542_v54 = vmul.f32 %v1510_v21, %v1362_v7  ;;  %v1427_v53 = vpop.f32.mrf.mxu3  ;;  %v946_v12 = vadd.f32 %v945_v10, %v2697_v14  ;;  %v994_v16 = vpop.f32.mrf.mxu1 }
 0x16b   : > { %v1543_v31 = vmul.f32 %v1511_v2, %v1427_v53 }
 0x16c   : > { %1574 = vst [vmem:[%s2811_s12 + $0x30] sm:$0xff] %v1542_v54  ;;  %v995_v63 = vadd.f32 %v994_v16, %v946_v12 }
 0x16d   : > { %1575 = vst [vmem:[%s2811_s12 + $0x38] sm:$0xff] %v1543_v31  ;;  %v1520_v31 = vadd.f32 %v2804_v60, %v2732_v45 }
 0x16e   : > { %v1513_v17 = vadd.f32 %v2802_v59, %v995_v63 }
 0x171   : > { %v1365_v6 = vpop.f32.mrf.mxu2  ;;  %v947_v13 = vpop.f32.mrf.mxu0 }
 0x172   : > { %v1544_v62 = vmul.f32 %v1512_v0, %v1365_v6  ;;  %v1430_v9 = vpop.f32.mrf.mxu3  ;;  %v948_v29 = vadd.f32 %v947_v13, %v2706_v3  ;;  %v996_v35 = vpop.f32.mrf.mxu1 }
 0x173   : > { %v1545_v27 = vmul.f32 %v1513_v17, %v1430_v9  ;;  %v1522_v9 = vadd.f32 %v2804_v60, %v2740_v11 }
 0x174   : > { %1576 = vst [vmem:[%s2811_s12 + $0x40] sm:$0xff] %v1544_v62  ;;  %v997_v14 = vadd.f32 %v996_v35, %v948_v29 }
 0x175   : > { %1577 = vst [vmem:[%s2811_s12 + $0x48] sm:$0xff] %v1545_v27 }
 0x176   : > { %v1515_v26 = vadd.f32 %v2802_v59, %v997_v14 }
 0x179   : > { %v1368_v20 = vpop.f32.mrf.mxu2  ;;  %v950_v24 = vpop.f32.mrf.mxu0 }
 0x17a   : > { %v1546_v52 = vmul.f32 %v1514_v18, %v1368_v20  ;;  %v1433_v22 = vpop.f32.mrf.mxu3  ;;  %v951_v25 = vadd.f32 %v950_v24, %v2717_v32  ;;  %v999_v28 = vpop.f32.mrf.mxu1  ;;  %v1524_v20 = vadd.f32 %v2804_v60, %v2750_v8 }
 0x17b   : > { %v1547_v41 = vmul.f32 %v1515_v26, %v1433_v22 }
 0x17c   : > { %1578 = vst [vmem:[%s2811_s12 + $0x50] sm:$0xff] %v1546_v52  ;;  %v1000_v3 = vadd.f32 %v999_v28, %v951_v25 }
 0x17d   : > { %1579 = vst [vmem:[%s2811_s12 + $0x58] sm:$0xff] %v1547_v41 }
 0x17e   : > { %v1517_v47 = vadd.f32 %v2802_v59, %v1000_v3 }
 0x181   : > { %v1371_v51 = vpop.f32.mrf.mxu2  ;;  %v952_v40 = vpop.f32.mrf.mxu0 }
 0x182   : > { %v1548_v39 = vmul.f32 %v1516_v19, %v1371_v51  ;;  %v1436_v33 = vpop.f32.mrf.mxu3  ;;  %v953_v42 = vadd.f32 %v952_v40, %v2724_v43  ;;  %v1001_v57 = vpop.f32.mrf.mxu1 }
 0x183   : > { %v1549_v34 = vmul.f32 %v1517_v47, %v1436_v33  ;;  %v1526_v47 = vadd.f32 %v2804_v60, %v2758_v30 }
 0x184   : > { %1580 = vst [vmem:[%s2811_s12 + $0x60] sm:$0xff] %v1548_v39  ;;  %v1002_v32 = vadd.f32 %v1001_v57, %v953_v42  ;;  %v1528_v57 = vadd.f32 %v2804_v60, %v2768_v23 }
 0x185   : > { %1581 = vst [vmem:[%s2811_s12 + $0x68] sm:$0xff] %v1549_v34 }
 0x186   : > { %v1519_v44 = vadd.f32 %v2802_v59, %v1002_v32 }
 0x189   : > { %v1374_v55 = vpop.f32.mrf.mxu2  ;;  %v955_v21 = vpop.f32.mrf.mxu0 }
 0x18a   : > { %v1550_v56 = vmul.f32 %v1518_v1, %v1374_v55  ;;  %v1439_v2 = vpop.f32.mrf.mxu3  ;;  %v956_v54 = vadd.f32 %v955_v21, %v2734_v46  ;;  %v1004_v53 = vpop.f32.mrf.mxu1 }
 0x18b   : > { %v1551_v7 = vmul.f32 %v1519_v44, %v1439_v2 }
 0x18c   : > { %1582 = vst [vmem:[%s2811_s12 + $0x70] sm:$0xff] %v1550_v56  ;;  %v1005_v43 = vadd.f32 %v1004_v53, %v956_v54 }
 0x18d   : > { %1583 = vst [vmem:[%s2811_s12 + $0x78] sm:$0xff] %v1551_v7  ;;  %v1530_v7 = vadd.f32 %v2804_v60, %v2776_v48 }
 0x18e   : > { %v1521_v10 = vadd.f32 %v2802_v59, %v1005_v43 }
 0x191   : > { %v1377_v12 = vpop.f32.mrf.mxu2  ;;  %v957_v63 = vpop.f32.mrf.mxu0 }
 0x192   : > { %v1552_v58 = vmul.f32 %v1520_v31, %v1377_v12  ;;  %v1442_v16 = vpop.f32.mrf.mxu3  ;;  %v958_v0 = vadd.f32 %v957_v63, %v2742_v61  ;;  %v1006_v6 = vpop.f32.mrf.mxu1 }
 0x193   : > { %v1553_v17 = vmul.f32 %v1521_v10, %v1442_v16  ;;  %v1532_v16 = vadd.f32 %v2804_v60, %v2786_v49 }
 0x194   : > { %1584 = vst [vmem:[%s2811_s12 + $0x80] sm:$0xff] %v1552_v58  ;;  %v1007_v46 = vadd.f32 %v1006_v6, %v958_v0 }
 0x195   : > { %1585 = vst [vmem:[%s2811_s12 + $0x88] sm:$0xff] %v1553_v17 }
 0x196   : > { %v1523_v62 = vadd.f32 %v2802_v59, %v1007_v46 }
 0x199   : > { %v1380_v13 = vpop.f32.mrf.mxu2  ;;  %v960_v29 = vpop.f32.mrf.mxu0 }
 0x19a   : > { %v1554_v45 = vmul.f32 %v1522_v9, %v1380_v13  ;;  %v1445_v27 = vpop.f32.mrf.mxu3  ;;  %v961_v14 = vadd.f32 %v960_v29, %v2752_v5  ;;  %v1009_v26 = vpop.f32.mrf.mxu1  ;;  %v1534_v9 = vadd.f32 %v2804_v60, %v2797_v36 }
 0x19b   : > { %v1555_v35 = vmul.f32 %v1523_v62, %v1445_v27 }
 0x19c   : > { %1586 = vst [vmem:[%s2811_s12 + $0x90] sm:$0xff] %v1554_v45  ;;  %v1010_v61 = vadd.f32 %v1009_v26, %v961_v14 }
 0x19d   : > { %1587 = vst [vmem:[%s2811_s12 + $0x98] sm:$0xff] %v1555_v35 }
 0x19e   : > { %v1525_v18 = vadd.f32 %v2802_v59, %v1010_v61 }
 0x1a1   : > { %v1383_v52 = vpop.f32.mrf.mxu2  ;;  %v962_v24 = vpop.f32.mrf.mxu0 }
 0x1a2   : > { %v1556_v11 = vmul.f32 %v1524_v20, %v1383_v52  ;;  %v1448_v22 = vpop.f32.mrf.mxu3  ;;  %v963_v25 = vadd.f32 %v962_v24, %v2760_v15  ;;  %v1011_v28 = vpop.f32.mrf.mxu1 }
 0x1a3   : > { %v1557_v41 = vmul.f32 %v1525_v18, %v1448_v22 }
 0x1a4   : > { %1588 = vst [vmem:[%s2811_s12 + $0xa0] sm:$0xff] %v1556_v11  ;;  %v1012_v5 = vadd.f32 %v1011_v28, %v963_v25 }
 0x1a5   : > { %1589 = vst [vmem:[%s2811_s12 + $0xa8] sm:$0xff] %v1557_v41 }
 0x1a6   : > { %v1527_v3 = vadd.f32 %v2802_v59, %v1012_v5 }
 0x1a9   : > { %v1386_v19 = vpop.f32.mrf.mxu2  ;;  %v965_v39 = vpop.f32.mrf.mxu0 }
 0x1aa   : > { %v1558_v8 = vmul.f32 %v1526_v47, %v1386_v19  ;;  %v1451_v51 = vpop.f32.mrf.mxu3  ;;  %v966_v40 = vadd.f32 %v965_v39, %v2770_v38  ;;  %v1014_v34 = vpop.f32.mrf.mxu1 }
 0x1ab   : > { %v1559_v33 = vmul.f32 %v1527_v3, %v1451_v51 }
 0x1ac   : > { %1590 = vst [vmem:[%s2811_s12 + $0xb0] sm:$0xff] %v1558_v8  ;;  %v1015_v15 = vadd.f32 %v1014_v34, %v966_v40 }
 0x1ad   : > { %1591 = vst [vmem:[%s2811_s12 + $0xb8] sm:$0xff] %v1559_v33 }
 0x1ae   : > { %v1529_v42 = vadd.f32 %v2802_v59, %v1015_v15 }
 0x1b1   : > { %v1389_v32 = vpop.f32.mrf.mxu2  ;;  %v967_v1 = vpop.f32.mrf.mxu0 }
 0x1b2   : > { %v1560_v30 = vmul.f32 %v1528_v57, %v1389_v32  ;;  %v1454_v44 = vpop.f32.mrf.mxu3  ;;  %v968_v56 = vadd.f32 %v967_v1, %v2778_v50  ;;  %v1016_v2 = vpop.f32.mrf.mxu1 }
 0x1b3   : > { %v1561_v55 = vmul.f32 %v1529_v42, %v1454_v44 }
 0x1b4   : > { %1592 = vst [vmem:[%s2811_s12 + $0xc0] sm:$0xff] %v1560_v30  ;;  %v1017_v38 = vadd.f32 %v1016_v2, %v968_v56 }
 0x1b5   : > { %1593 = vst [vmem:[%s2811_s12 + $0xc8] sm:$0xff] %v1561_v55 }
 0x1b6   : > { %v1531_v21 = vadd.f32 %v2802_v59, %v1017_v38 }
 0x1b9   : > { %v1392_v23 = vpop.f32.mrf.mxu2  ;;  %v970_v43 = vpop.f32.mrf.mxu0 }
 0x1ba   : > { %v1562_v54 = vmul.f32 %v1530_v7, %v1392_v23  ;;  %v1457_v53 = vpop.f32.mrf.mxu3  ;;  %v971_v31 = vadd.f32 %v970_v43, %v2788_v37  ;;  %v1019_v12 = vpop.f32.mrf.mxu1 }
 0x1bb   : > { %v1563_v10 = vmul.f32 %v1531_v21, %v1457_v53 }
 0x1bc   : > { %1594 = vst [vmem:[%s2811_s12 + $0xd0] sm:$0xff] %v1562_v54  ;;  %v1020_v50 = vadd.f32 %v1019_v12, %v971_v31 }
 0x1bd   : > { %1595 = vst [vmem:[%s2811_s12 + $0xd8] sm:$0xff] %v1563_v10 }
 0x1be   : > { %v1533_v58 = vadd.f32 %v2802_v59, %v1020_v50 }
 0x1c1   : > { %v1395_v48 = vpop.f32.mrf.mxu2  ;;  %v972_v0 = vpop.f32.mrf.mxu0 }
 0x1c2   : > { %v1564_v63 = vmul.f32 %v1532_v16, %v1395_v48  ;;  %v1460_v17 = vpop.f32.mrf.mxu3  ;;  %v973_v46 = vadd.f32 %v972_v0, %v2799_v4  ;;  %v1021_v37 = vpop.f32.mrf.mxu1 }
 0x1c3   : > { %v1565_v6 = vmul.f32 %v1533_v58, %v1460_v17 }
 0x1c4   : > { %1596 = vst [vmem:[%s2811_s12 + $0xe0] sm:$0xff] %v1564_v63  ;;  %v1022_v62 = vadd.f32 %v1021_v37, %v973_v46 }
 0x1c5   : > { %1597 = vst [vmem:[%s2811_s12 + $0xe8] sm:$0xff] %v1565_v6 }
 0x1c6   : > { %v1535_v49 = vadd.f32 %v2802_v59, %v1022_v62 }
 0x1c9   : > { %v1398_v4 = vpop.f32.mrf.mxu2 }
 0x1ca   : > { %v1566_v13 = vmul.f32 %v1534_v9, %v1398_v4  ;;  %v1463_v45 = vpop.f32.mrf.mxu3 }
 0x1cb   : > { %v1567_v27 = vmul.f32 %v1535_v49, %v1463_v45 }
 0x1cc   : > { %1598 = vst [vmem:[%s2811_s12 + $0xf0] sm:$0xff] %v1566_v13 }
 0x1cd   : > { %1599 = vst [vmem:[%s2811_s12 + $0xf8] sm:$0xff] %v1567_v27 }
 0x1ce   : > { %2248 = shalt.err (!%p2245_p3)
}
 0x1cf   : > { %s2316_s14 = smov 256   ;;  %s2317_s11 = smov 16  }
 0x1d0   : > { %2083 = dma.vmem_to_hbm [thread:$0]  (%p2423_p5), %s1617_s21, 4096, %s1619_s26, %s1601_s28, %s2316_s14, %s2316_s14, %s2317_s11  }
 0x1d1 PF: > { %s1633_s27 = sand.u32 1, %s2287_s18   ;;  %p2094_p7 = pnand %p1769_p11, %p2397_p6 }
 0x1d2   : > { %s1634_s12 = scalar_lea.sflag [#allocation4], %s1633_s27 }
 0x1d3   : > { %p2095_p9 = pneg %p2094_p7 }
 0x1d5   : > { %2282 = dma.done.wait (%p2095_p9), %s1634_s12, 4096  }
 0x1d6   : > { %2284 = vsyncadd (%p2095_p9), %s1634_s12, 4294963200  ;;  %s22_s23 = sadd.s32 1, %s2307_s23   ;;  %s2959_s15 = sld [smem:[#allocation11_spill]] }
 0x1d7   : > { %p19_p10 = scmp.ge.s32.totalorder %s22_s23, 4   ;;  %s2960_s18 = smov %s2291_s19 }
 0x1d8   : > { %s2961_s19 = smov %s2295_s20  ;;  %s2962_s20 = smov %s2432_s25 }
 0x1d9   : > { %s2963_s21 = smov %s2303_s22  ;;  %21 = sbr.rel (!%p19_p10) target bundleno = 9 (0x9), region = 111 }
 0x1dc   : > { %s2964_s22 = smov %s2959_s15 }
 0x1de   :  { %1640 = vsyncpa [#allocation3], 1 }
 0x1df   :  { %1642 = vsyncpa [#allocation3 + $0x1], 1 }
 0x1e0   :  { %1643 = vsyncpa [#allocation6], 1 }
 0x1e1   :  { %1644 = vsyncpa [#allocation4], 1 }
 0x1e2   :  { %1646 = vsyncpa [#allocation4 + $0x1], 1 }

</bundles_post_ra>
